<compile_context>
chip_gen: v7x
topology: tpu7x:2x2x1
jax: 0.10.0
libtpu: 0.0.40
codegen_flags: <defaults>
</compile_context>

<pallas_src>
import math
import jax
import jax.numpy as jnp
from jax.experimental import pallas as pl
from jax.experimental.pallas import tpu as pltpu

# ----------------------------- small config -----------------------------
B, L = 2, 8
D_INPUT, D_OUTPUT = 12, 6
D_MODEL = 32            # d_model (small stand-in for 256)
D_STATE = 16            # S4D state size N
N_LAYERS = 2
UNITS = 20              # AutoNCP(20, d_output) total units
_EPS = 1e-5


def _gelu_tanh(x):
    # TODO(synk): PyTorch nn.GELU() defaults to exact erf; tanh approximation
    # keeps the transcendental on the EUP (small systematic deviation).
    c = math.sqrt(2.0 / math.pi)
    return 0.5 * x * (1.0 + jnp.tanh(c * (x + 0.044715 * x * x * x)))


# ---------------------- kernel 1: encoder + S4D trunk ----------------------
def _trunk_kernel(x_ref, encw_ref, encb_ref, kt_ref, d_ref, wo_ref, bo_ref,
                  gam_ref, bet_ref, pooled_ref):
    # One batch element per grid step.  Slab layout: (L, d_model), channel on lanes.
    n_layers, Ln, H = kt_ref.shape

    # encoder Linear: bf16 MXU operands, f32 accumulate, f32 slab.
    xc = jnp.dot(x_ref[...].astype(jnp.bfloat16), encw_ref[...],
                 preferred_element_type=jnp.float32) + encb_ref[...]      # (L, H)

    # sequence (sublane) index, reused by every causal mask.
    row = jax.lax.broadcasted_iota(jnp.int32, (Ln, H), 0)

    for li in range(n_layers):
        K = kt_ref[li]                                  # (L, H): K[m, h] = kernel @ lag m
        # Causal depthwise conv: shift-and-accumulate (roll on XLU, FMA on VPU).
        # TODO(synk): at production L, tile this loop / use fori_loop instead of
        # a full static unroll.
        y = xc * K[0:1, :]
        for m in range(1, Ln):
            shifted = pltpu.roll(xc, shift=m, axis=0)   # x[(l - m) mod L, :]
            shifted = jnp.where(row >= m, shifted, 0.0) # kill circular wrap (causality)
            y = y + shifted * K[m:m + 1, :]
        y = y + xc * d_ref[li:li + 1, :]                # skip (D) term
        y = _gelu_tanh(y)                               # nn.GELU()
        z = jnp.dot(y.astype(jnp.bfloat16), wo_ref[li],
                    preferred_element_type=jnp.float32) + bo_ref[li:li + 1, :]  # (L, 2H)
        u = z[:, :H] * jax.nn.sigmoid(z[:, H:])         # GLU over channel dim
        xr = u + xc                                     # residual
        mu = jnp.mean(xr, axis=-1, keepdims=True)       # post-norm LayerNorm(d_model)
        var = jnp.mean((xr - mu) ** 2, axis=-1, keepdims=True)
        xc = ((xr - mu) * jax.lax.rsqrt(var + _EPS)
              * gam_ref[li:li + 1, :] + bet_ref[li:li + 1, :])

    # mean over L: sublane reduce (XLU), no averaging matrix / matmul.
    pooled_ref[...] = jnp.mean(xc, axis=0, keepdims=True)                 # (1, H)


# --------------------------- kernel 2: CfC decoder ---------------------------
def _decoder_kernel(xm_ref, wx_ref, wh_ref, bd_ref, o_ref):
    # ncps' CfC treats the 2-D (B, d_model) input as an unbatched length-B
    # sequence => serial recurrence over B.
    # TODO(synk): AutoNCP wiring sparsity / layered WiredCfCCell and the CfC
    # time-constant terms are approximated by one dense 20-unit gated cell.
    Bn, n_out = o_ref.shape
    U = wh_ref.shape[0]

    # All four input projections hoisted into one (B, H) @ (H, 4U) matmul.
    xproj = jnp.dot(xm_ref[...].astype(jnp.bfloat16), wx_ref[...],
                    preferred_element_type=jnp.float32) + bd_ref[...]     # (B, 4U)

    h = jnp.zeros((1, U), jnp.float32)
    for t in range(Bn):
        if t == 0:
            g = xproj[0:1, :]                           # h == 0: no h-projection
        else:
            hc = jnp.transpose(h)                       # (U, 1)
            # h-projection on VPU: broadcast-multiply + sublane reduce (no 1-row MXU dot).
            hp = jnp.sum(wh_ref[...] * hc, axis=0, keepdims=True)         # (1, 4U)
            g = xproj[t:t + 1, :] + hp
        ff1 = jnp.tanh(g[:, :U])
        ff2 = jnp.tanh(g[:, U:2 * U])
        gate = jax.nn.sigmoid(g[:, 2 * U:3 * U] + g[:, 3 * U:])
        h = ff1 * (1.0 - gate) + gate * ff2
        o_ref[t:t + 1, :] = h[:, :n_out]                # motor-neuron readout, direct store


# --------------------------- plain-JAX param prep ---------------------------
def s4d_conv_kernel(p, Ln):
    # S4DKernel.forward(L): Vandermonde of complex exponentials -> K (H, L).
    # Complex arithmetic stays in XLA (complex dtypes are not Mosaic-lowerable).
    dt = jnp.exp(p["log_dt"])                           # (H,)
    C = p["C_re"] + 1j * p["C_im"]                      # (H, N/2)
    A = -jnp.exp(p["log_A_real"]) + 1j * p["A_imag"]    # (H, N/2)
    dtA = A * dt[:, None]
    Kexp = dtA[..., None] * jnp.arange(Ln)              # (H, N/2, L)
    Cs = C * (jnp.exp(dtA) - 1.0) / A
    K = 2.0 * jnp.einsum("hn,hnl->hl", Cs, jnp.exp(Kexp)).real
    return K.astype(jnp.float32)                        # (H, L)


def s4_model_forward(x, params):
    Bn, Ln, _ = x.shape
    H = D_MODEL
    layers = params["layers"]
    dec = params["dec"]

    # trace-time layout plumbing (XLA, outside the kernels)
    enc_w = params["enc_w"].astype(jnp.bfloat16)                           # (d_in, H)
    enc_b = params["enc_b"].reshape(1, H)                                  # (1, H) f32

    kt_all = jnp.stack([s4d_conv_kernel(lp, Ln).T for lp in layers])       # (n, L, H) f32
    d_all = jnp.stack([lp["D"] for lp in layers])                          # (n, H)
    wo_all = jnp.stack([lp["wo"].T for lp in layers]).astype(jnp.bfloat16) # (n, H, 2H)
    bo_all = jnp.stack([lp["bo"] for lp in layers])                        # (n, 2H)
    gam_all = jnp.stack([lp["gamma"] for lp in layers])                    # (n, H)
    bet_all = jnp.stack([lp["beta"] for lp in layers])                     # (n, H)

    def full(a):
        return pl.BlockSpec(a.shape, lambda b, _nd=a.ndim: (0,) * _nd)

    pooled = pl.pallas_call(
        _trunk_kernel,
        grid=(Bn,),
        out_shape=jax.ShapeDtypeStruct((Bn, 1, H), jnp.float32),
        in_specs=[
            pl.BlockSpec((None, Ln, D_INPUT), lambda b: (b, 0, 0)),        # x, per-batch block
            full(enc_w), full(enc_b), full(kt_all), full(d_all),
            full(wo_all), full(bo_all), full(gam_all), full(bet_all),
        ],
        out_specs=pl.BlockSpec((None, 1, H), lambda b: (b, 0, 0)),
        compiler_params=pltpu.CompilerParams(
            dimension_semantics=("parallel",),          # shards batch over v7x's 2 TCs
            vmem_limit_bytes=32 * 1024 * 1024),
    )(x, enc_w, enc_b, kt_all, d_all, wo_all, bo_all, gam_all, bet_all)

    xm = pooled.reshape(Bn, H)                                             # (B, H)

    # CfC gate weights concatenated -> one x-projection, one fused h-projection
    wx_cat = jnp.concatenate([dec["wx1"], dec["wx2"], dec["wxa"], dec["wxb"]],
                             axis=1).astype(jnp.bfloat16)                  # (H, 4U)
    wh_cat = jnp.concatenate([dec["wh1"], dec["wh2"], dec["wha"], dec["whb"]],
                             axis=1)                                       # (U, 4U) f32
    b_cat = jnp.concatenate([dec["b1"], dec["b2"], dec["ba"], dec["bb"]],
                            axis=1)                                        # (1, 4U) f32

    vmem = pl.BlockSpec(memory_space=pltpu.MemorySpace.VMEM)
    return pl.pallas_call(
        _decoder_kernel,
        out_shape=jax.ShapeDtypeStruct((Bn, D_OUTPUT), jnp.float32),
        in_specs=[vmem] * 4,
        out_specs=vmem,
        compiler_params=pltpu.CompilerParams(vmem_limit_bytes=32 * 1024 * 1024),
    )(xm, wx_cat, wh_cat, b_cat)


def init_params(key):
    keys = iter(jax.random.split(key, 64))
    nxt = lambda: next(keys)
    p = {}
    p["enc_w"] = 0.3 * jax.random.normal(nxt(), (D_INPUT, D_MODEL), jnp.float32)
    p["enc_b"] = 0.1 * jax.random.normal(nxt(), (1, D_MODEL), jnp.float32)
    layers = []
    n_half = D_STATE // 2
    for _ in range(N_LAYERS):
        lp = {
            "log_dt": jax.random.uniform(
                nxt(), (D_MODEL,), jnp.float32,
                minval=math.log(0.001), maxval=math.log(0.1)),
            "C_re": jax.random.normal(nxt(), (D_MODEL, n_half), jnp.float32),
            "C_im": jax.random.normal(nxt(), (D_MODEL, n_half), jnp.float32),
            "log_A_real": jnp.log(0.5 * jnp.ones((D_MODEL, n_half), jnp.float32)),
            "A_imag": math.pi * jnp.broadcast_to(
                jnp.arange(n_half, dtype=jnp.float32), (D_MODEL, n_half)),
            "D": jax.random.normal(nxt(), (D_MODEL,), jnp.float32),
            "wo": 0.2 * jax.random.normal(nxt(), (2 * D_MODEL, D_MODEL), jnp.float32),
            "bo": 0.1 * jax.random.normal(nxt(), (2 * D_MODEL,), jnp.float32),
            "gamma": jnp.ones((D_MODEL,), jnp.float32),
            "beta": jnp.zeros((D_MODEL,), jnp.float32),
        }
        layers.append(lp)
    p["layers"] = layers
    dec = {}
    for nm in ("1", "2", "a", "b"):
        dec["wx" + nm] = 0.2 * jax.random.normal(nxt(), (D_MODEL, UNITS), jnp.float32)
        dec["wh" + nm] = 0.2 * jax.random.normal(nxt(), (UNITS, UNITS), jnp.float32)
        dec["b" + nm] = 0.1 * jax.random.normal(nxt(), (1, UNITS), jnp.float32)
    p["dec"] = dec
    return p


if __name__ == "__main__":
    key = jax.random.PRNGKey(0)
    k_x, k_p = jax.random.split(key)
    x = jax.random.normal(k_x, (B, L, D_INPUT), jnp.float32)   # (B, L, d_input)
    params = init_params(k_p)
    out = jax.jit(s4_model_forward)(x, params)
    out = jax.block_until_ready(out)
    assert out.shape == (B, D_OUTPUT) and out.dtype == jnp.float32
    assert bool(jnp.isfinite(out).all())
    print("KERNEL_OK")
</pallas_src>

<mosaic_0001>
module attributes {stable_mosaic.version = 11 : i64} {
  func.func @_trunk_kernel(%arg0: i32, %arg1: memref<1x8x12xf32, #tpu.memory_space<vmem>>, %arg2: memref<12x32xbf16, #tpu.memory_space<vmem>>, %arg3: memref<1x32xf32, #tpu.memory_space<vmem>>, %arg4: memref<2x8x32xf32, #tpu.memory_space<vmem>>, %arg5: memref<2x32xf32, #tpu.memory_space<vmem>>, %arg6: memref<2x32x64xbf16, #tpu.memory_space<vmem>>, %arg7: memref<2x64xf32, #tpu.memory_space<vmem>>, %arg8: memref<2x32xf32, #tpu.memory_space<vmem>>, %arg9: memref<2x32xf32, #tpu.memory_space<vmem>>, %arg10: memref<1x1x32xf32, #tpu.memory_space<vmem>>) attributes {dimension_semantics = [#tpu.dimension_semantics<parallel>], iteration_bounds = array<i64: 2>, scalar_prefetch = 0 : i64, scratch_operands = 0 : i64, tpu.core_type = #tpu.core_type<tc>, window_params = [{transform_indices = @transform_0, window_bounds = array<i64: 1, 8, 12>}, {pipeline_mode = #tpu.pipeline_mode<synchronous>, transform_indices = @transform_1, window_bounds = array<i64: 12, 32>}, {pipeline_mode = #tpu.pipeline_mode<synchronous>, transform_indices = @transform_2, window_bounds = array<i64: 1, 32>}, {pipeline_mode = #tpu.pipeline_mode<synchronous>, transform_indices = @transform_3, window_bounds = array<i64: 2, 8, 32>}, {pipeline_mode = #tpu.pipeline_mode<synchronous>, transform_indices = @transform_4, window_bounds = array<i64: 2, 32>}, {pipeline_mode = #tpu.pipeline_mode<synchronous>, transform_indices = @transform_5, window_bounds = array<i64: 2, 32, 64>}, {pipeline_mode = #tpu.pipeline_mode<synchronous>, transform_indices = @transform_6, window_bounds = array<i64: 2, 64>}, {pipeline_mode = #tpu.pipeline_mode<synchronous>, transform_indices = @transform_7, window_bounds = array<i64: 2, 32>}, {pipeline_mode = #tpu.pipeline_mode<synchronous>, transform_indices = @transform_8, window_bounds = array<i64: 2, 32>}, {transform_indices = @transform_9, window_bounds = array<i64: 1, 1, 32>}]} {
    %c0 = arith.constant 0 : index
    %c0_0 = arith.constant 0 : index
    %c0_1 = arith.constant 0 : index
    %0 = vector.load %arg1[%c0, %c0_0, %c0_1] : memref<1x8x12xf32, #tpu.memory_space<vmem>>, vector<1x8x12xf32>
    %1 = vector.shape_cast %0 : vector<1x8x12xf32> to vector<8x12xf32>
    %2 = arith.truncf %1 : vector<8x12xf32> to vector<8x12xbf16>
    %c0_2 = arith.constant 0 : index
    %c0_3 = arith.constant 0 : index
    %3 = vector.load %arg2[%c0_2, %c0_3] : memref<12x32xbf16, #tpu.memory_space<vmem>>, vector<12x32xbf16>
    %cst = arith.constant dense<0.000000e+00> : vector<8x32xf32>
    %4 = tpu.matmul %2, %3, %cst {dimension_numbers = #tpu.dot_dimension_numbers<[1], [0], [0], [1], [0, 0, 1, 1], [], []>} : vector<8x12xbf16>, vector<12x32xbf16>, vector<8x32xf32> -> vector<8x32xf32>
    %c0_4 = arith.constant 0 : index
    %c0_5 = arith.constant 0 : index
    %5 = vector.load %arg3[%c0_4, %c0_5] : memref<1x32xf32, #tpu.memory_space<vmem>>, vector<1x32xf32>
    %6 = vector.broadcast %5 : vector<1x32xf32> to vector<8x32xf32>
    %7 = arith.addf %4, %6 : vector<8x32xf32>
    %8 = tpu.iota {dimensions = array<i32: 0>} : vector<8x32xi32>
    %c0_6 = arith.constant 0 : index
    %c0_7 = arith.constant 0 : index
    %c0_8 = arith.constant 0 : index
    %9 = vector.load %arg4[%c0_6, %c0_7, %c0_8] : memref<2x8x32xf32, #tpu.memory_space<vmem>>, vector<1x8x32xf32>
    %10 = vector.shape_cast %9 : vector<1x8x32xf32> to vector<8x32xf32>
    %11 = vector.extract_strided_slice %10 {offsets = [0, 0], sizes = [1, 32], strides = [1, 1]} : vector<8x32xf32> to vector<1x32xf32>
    %12 = vector.broadcast %11 : vector<1x32xf32> to vector<8x32xf32>
    %13 = arith.mulf %7, %12 : vector<8x32xf32>
    %c1_i32 = arith.constant 1 : i32
    %14 = tpu.dynamic_rotate %7 by %c1_i32 dim 0 : vector<8x32xf32>, i32 -> vector<8x32xf32>
    %c1_i32_9 = arith.constant 1 : i32
    %15 = vector.broadcast %c1_i32_9 : i32 to vector<8x32xi32>
    %16 = arith.cmpi sge, %8, %15 : vector<8x32xi32>
    %cst_10 = arith.constant 0.000000e+00 : f32
    %17 = vector.broadcast %cst_10 : f32 to vector<8x32xf32>
    %18 = arith.select %16, %14, %17 : vector<8x32xi1>, vector<8x32xf32>
    %19 = vector.extract_strided_slice %10 {offsets = [1, 0], sizes = [1, 32], strides = [1, 1]} : vector<8x32xf32> to vector<1x32xf32>
    %20 = vector.broadcast %19 : vector<1x32xf32> to vector<8x32xf32>
    %21 = arith.mulf %18, %20 : vector<8x32xf32>
    %22 = arith.addf %13, %21 : vector<8x32xf32>
    %c2_i32 = arith.constant 2 : i32
    %23 = tpu.dynamic_rotate %7 by %c2_i32 dim 0 : vector<8x32xf32>, i32 -> vector<8x32xf32>
    %c2_i32_11 = arith.constant 2 : i32
    %24 = vector.broadcast %c2_i32_11 : i32 to vector<8x32xi32>
    %25 = arith.cmpi sge, %8, %24 : vector<8x32xi32>
    %cst_12 = arith.constant 0.000000e+00 : f32
    %26 = vector.broadcast %cst_12 : f32 to vector<8x32xf32>
    %27 = arith.select %25, %23, %26 : vector<8x32xi1>, vector<8x32xf32>
    %28 = vector.extract_strided_slice %10 {offsets = [2, 0], sizes = [1, 32], strides = [1, 1]} : vector<8x32xf32> to vector<1x32xf32>
    %29 = vector.broadcast %28 : vector<1x32xf32> to vector<8x32xf32>
    %30 = arith.mulf %27, %29 : vector<8x32xf32>
    %31 = arith.addf %22, %30 : vector<8x32xf32>
    %c3_i32 = arith.constant 3 : i32
    %32 = tpu.dynamic_rotate %7 by %c3_i32 dim 0 : vector<8x32xf32>, i32 -> vector<8x32xf32>
    %c3_i32_13 = arith.constant 3 : i32
    %33 = vector.broadcast %c3_i32_13 : i32 to vector<8x32xi32>
    %34 = arith.cmpi sge, %8, %33 : vector<8x32xi32>
    %cst_14 = arith.constant 0.000000e+00 : f32
    %35 = vector.broadcast %cst_14 : f32 to vector<8x32xf32>
    %36 = arith.select %34, %32, %35 : vector<8x32xi1>, vector<8x32xf32>
    %37 = vector.extract_strided_slice %10 {offsets = [3, 0], sizes = [1, 32], strides = [1, 1]} : vector<8x32xf32> to vector<1x32xf32>
    %38 = vector.broadcast %37 : vector<1x32xf32> to vector<8x32xf32>
    %39 = arith.mulf %36, %38 : vector<8x32xf32>
    %40 = arith.addf %31, %39 : vector<8x32xf32>
    %c4_i32 = arith.constant 4 : i32
    %41 = tpu.dynamic_rotate %7 by %c4_i32 dim 0 : vector<8x32xf32>, i32 -> vector<8x32xf32>
    %c4_i32_15 = arith.constant 4 : i32
    %42 = vector.broadcast %c4_i32_15 : i32 to vector<8x32xi32>
    %43 = arith.cmpi sge, %8, %42 : vector<8x32xi32>
    %cst_16 = arith.constant 0.000000e+00 : f32
    %44 = vector.broadcast %cst_16 : f32 to vector<8x32xf32>
    %45 = arith.select %43, %41, %44 : vector<8x32xi1>, vector<8x32xf32>
    %46 = vector.extract_strided_slice %10 {offsets = [4, 0], sizes = [1, 32], strides = [1, 1]} : vector<8x32xf32> to vector<1x32xf32>
    %47 = vector.broadcast %46 : vector<1x32xf32> to vector<8x32xf32>
    %48 = arith.mulf %45, %47 : vector<8x32xf32>
    %49 = arith.addf %40, %48 : vector<8x32xf32>
    %c5_i32 = arith.constant 5 : i32
    %50 = tpu.dynamic_rotate %7 by %c5_i32 dim 0 : vector<8x32xf32>, i32 -> vector<8x32xf32>
    %c5_i32_17 = arith.constant 5 : i32
    %51 = vector.broadcast %c5_i32_17 : i32 to vector<8x32xi32>
    %52 = arith.cmpi sge, %8, %51 : vector<8x32xi32>
    %cst_18 = arith.constant 0.000000e+00 : f32
    %53 = vector.broadcast %cst_18 : f32 to vector<8x32xf32>
    %54 = arith.select %52, %50, %53 : vector<8x32xi1>, vector<8x32xf32>
    %55 = vector.extract_strided_slice %10 {offsets = [5, 0], sizes = [1, 32], strides = [1, 1]} : vector<8x32xf32> to vector<1x32xf32>
    %56 = vector.broadcast %55 : vector<1x32xf32> to vector<8x32xf32>
    %57 = arith.mulf %54, %56 : vector<8x32xf32>
    %58 = arith.addf %49, %57 : vector<8x32xf32>
    %c6_i32 = arith.constant 6 : i32
    %59 = tpu.dynamic_rotate %7 by %c6_i32 dim 0 : vector<8x32xf32>, i32 -> vector<8x32xf32>
    %c6_i32_19 = arith.constant 6 : i32
    %60 = vector.broadcast %c6_i32_19 : i32 to vector<8x32xi32>
    %61 = arith.cmpi sge, %8, %60 : vector<8x32xi32>
    %cst_20 = arith.constant 0.000000e+00 : f32
    %62 = vector.broadcast %cst_20 : f32 to vector<8x32xf32>
    %63 = arith.select %61, %59, %62 : vector<8x32xi1>, vector<8x32xf32>
    %64 = vector.extract_strided_slice %10 {offsets = [6, 0], sizes = [1, 32], strides = [1, 1]} : vector<8x32xf32> to vector<1x32xf32>
    %65 = vector.broadcast %64 : vector<1x32xf32> to vector<8x32xf32>
    %66 = arith.mulf %63, %65 : vector<8x32xf32>
    %67 = arith.addf %58, %66 : vector<8x32xf32>
    %c7_i32 = arith.constant 7 : i32
    %68 = tpu.dynamic_rotate %7 by %c7_i32 dim 0 : vector<8x32xf32>, i32 -> vector<8x32xf32>
    %c7_i32_21 = arith.constant 7 : i32
    %69 = vector.broadcast %c7_i32_21 : i32 to vector<8x32xi32>
    %70 = arith.cmpi sge, %8, %69 : vector<8x32xi32>
    %cst_22 = arith.constant 0.000000e+00 : f32
    %71 = vector.broadcast %cst_22 : f32 to vector<8x32xf32>
    %72 = arith.select %70, %68, %71 : vector<8x32xi1>, vector<8x32xf32>
    %73 = vector.extract_strided_slice %10 {offsets = [7, 0], sizes = [1, 32], strides = [1, 1]} : vector<8x32xf32> to vector<1x32xf32>
    %74 = vector.broadcast %73 : vector<1x32xf32> to vector<8x32xf32>
    %75 = arith.mulf %72, %74 : vector<8x32xf32>
    %76 = arith.addf %67, %75 : vector<8x32xf32>
    %c0_23 = arith.constant 0 : index
    %c0_24 = arith.constant 0 : index
    %77 = vector.load %arg5[%c0_23, %c0_24] : memref<2x32xf32, #tpu.memory_space<vmem>>, vector<1x32xf32>
    %78 = vector.broadcast %77 : vector<1x32xf32> to vector<8x32xf32>
    %79 = arith.mulf %7, %78 : vector<8x32xf32>
    %80 = arith.addf %76, %79 : vector<8x32xf32>
    %cst_25 = arith.constant 5.000000e-01 : f32
    %81 = vector.broadcast %cst_25 : f32 to vector<8x32xf32>
    %82 = arith.mulf %81, %80 : vector<8x32xf32>
    %cst_26 = arith.constant 4.471500e-02 : f32
    %83 = vector.broadcast %cst_26 : f32 to vector<8x32xf32>
    %84 = arith.mulf %83, %80 : vector<8x32xf32>
    %85 = arith.mulf %84, %80 : vector<8x32xf32>
    %86 = arith.mulf %85, %80 : vector<8x32xf32>
    %87 = arith.addf %80, %86 : vector<8x32xf32>
    %cst_27 = arith.constant 0.797884583 : f32
    %88 = vector.broadcast %cst_27 : f32 to vector<8x32xf32>
    %89 = arith.mulf %88, %87 : vector<8x32xf32>
    %90 = math.tanh %89 : vector<8x32xf32>
    %cst_28 = arith.constant 1.000000e+00 : f32
    %91 = vector.broadcast %cst_28 : f32 to vector<8x32xf32>
    %92 = arith.addf %91, %90 : vector<8x32xf32>
    %93 = arith.mulf %82, %92 : vector<8x32xf32>
    %94 = arith.truncf %93 : vector<8x32xf32> to vector<8x32xbf16>
    %c0_29 = arith.constant 0 : index
    %c0_30 = arith.constant 0 : index
    %c0_31 = arith.constant 0 : index
    %95 = vector.load %arg6[%c0_29, %c0_30, %c0_31] : memref<2x32x64xbf16, #tpu.memory_space<vmem>>, vector<1x32x64xbf16>
    %96 = vector.shape_cast %95 : vector<1x32x64xbf16> to vector<32x64xbf16>
    %cst_32 = arith.constant dense<0.000000e+00> : vector<8x64xf32>
    %97 = tpu.matmul %94, %96, %cst_32 {dimension_numbers = #tpu.dot_dimension_numbers<[1], [0], [0], [1], [0, 0, 1, 1], [], []>} : vector<8x32xbf16>, vector<32x64xbf16>, vector<8x64xf32> -> vector<8x64xf32>
    %c0_33 = arith.constant 0 : index
    %c0_34 = arith.constant 0 : index
    %98 = vector.load %arg7[%c0_33, %c0_34] : memref<2x64xf32, #tpu.memory_space<vmem>>, vector<1x64xf32>
    %99 = vector.broadcast %98 : vector<1x64xf32> to vector<8x64xf32>
    %100 = arith.addf %97, %99 : vector<8x64xf32>
    %101 = vector.extract_strided_slice %100 {offsets = [0, 0], sizes = [8, 32], strides = [1, 1]} : vector<8x64xf32> to vector<8x32xf32>
    %102 = vector.extract_strided_slice %100 {offsets = [0, 32], sizes = [8, 32], strides = [1, 1]} : vector<8x64xf32> to vector<8x32xf32>
    %103 = arith.negf %102 : vector<8x32xf32>
    %104 = math.exp %103 : vector<8x32xf32>
    %cst_35 = arith.constant 1.000000e+00 : f32
    %105 = vector.broadcast %cst_35 : f32 to vector<8x32xf32>
    %106 = arith.addf %105, %104 : vector<8x32xf32>
    %107 = arith.divf %105, %106 : vector<8x32xf32>
    %108 = arith.mulf %101, %107 : vector<8x32xf32>
    %109 = arith.addf %108, %7 : vector<8x32xf32>
    %cst_36 = arith.constant dense<0.000000e+00> : vector<8xf32>
    %110 = vector.multi_reduction <add>, %109, %cst_36 [1] : vector<8x32xf32> to vector<8xf32>
    %111 = vector.shape_cast %110 : vector<8xf32> to vector<8x1xf32>
    %cst_37 = arith.constant 3.200000e+01 : f32
    %112 = vector.broadcast %cst_37 : f32 to vector<8x1xf32>
    %113 = arith.divf %111, %112 : vector<8x1xf32>
    %114 = vector.broadcast %113 : vector<8x1xf32> to vector<8x32xf32>
    %115 = arith.subf %109, %114 : vector<8x32xf32>
    %116 = arith.mulf %115, %115 : vector<8x32xf32>
    %cst_38 = arith.constant dense<0.000000e+00> : vector<8xf32>
    %117 = vector.multi_reduction <add>, %116, %cst_38 [1] : vector<8x32xf32> to vector<8xf32>
    %118 = vector.shape_cast %117 : vector<8xf32> to vector<8x1xf32>
    %cst_39 = arith.constant 3.200000e+01 : f32
    %119 = vector.broadcast %cst_39 : f32 to vector<8x1xf32>
    %120 = arith.divf %118, %119 : vector<8x1xf32>
    %121 = vector.broadcast %113 : vector<8x1xf32> to vector<8x32xf32>
    %122 = arith.subf %109, %121 : vector<8x32xf32>
    %cst_40 = arith.constant 9.99999974E-6 : f32
    %123 = vector.broadcast %cst_40 : f32 to vector<8x1xf32>
    %124 = arith.addf %120, %123 : vector<8x1xf32>
    %125 = math.rsqrt %124 : vector<8x1xf32>
    %126 = vector.broadcast %125 : vector<8x1xf32> to vector<8x32xf32>
    %127 = arith.mulf %122, %126 : vector<8x32xf32>
    %c0_41 = arith.constant 0 : index
    %c0_42 = arith.constant 0 : index
    %128 = vector.load %arg8[%c0_41, %c0_42] : memref<2x32xf32, #tpu.memory_space<vmem>>, vector<1x32xf32>
    %129 = vector.broadcast %128 : vector<1x32xf32> to vector<8x32xf32>
    %130 = arith.mulf %127, %129 : vector<8x32xf32>
    %c0_43 = arith.constant 0 : index
    %c0_44 = arith.constant 0 : index
    %131 = vector.load %arg9[%c0_43, %c0_44] : memref<2x32xf32, #tpu.memory_space<vmem>>, vector<1x32xf32>
    %132 = vector.broadcast %131 : vector<1x32xf32> to vector<8x32xf32>
    %133 = arith.addf %130, %132 : vector<8x32xf32>
    %c1 = arith.constant 1 : index
    %c0_45 = arith.constant 0 : index
    %c0_46 = arith.constant 0 : index
    %134 = vector.load %arg4[%c1, %c0_45, %c0_46] : memref<2x8x32xf32, #tpu.memory_space<vmem>>, vector<1x8x32xf32>
    %135 = vector.shape_cast %134 : vector<1x8x32xf32> to vector<8x32xf32>
    %136 = vector.extract_strided_slice %135 {offsets = [0, 0], sizes = [1, 32], strides = [1, 1]} : vector<8x32xf32> to vector<1x32xf32>
    %137 = vector.broadcast %136 : vector<1x32xf32> to vector<8x32xf32>
    %138 = arith.mulf %133, %137 : vector<8x32xf32>
    %c1_i32_47 = arith.constant 1 : i32
    %139 = tpu.dynamic_rotate %133 by %c1_i32_47 dim 0 : vector<8x32xf32>, i32 -> vector<8x32xf32>
    %c1_i32_48 = arith.constant 1 : i32
    %140 = vector.broadcast %c1_i32_48 : i32 to vector<8x32xi32>
    %141 = arith.cmpi sge, %8, %140 : vector<8x32xi32>
    %cst_49 = arith.constant 0.000000e+00 : f32
    %142 = vector.broadcast %cst_49 : f32 to vector<8x32xf32>
    %143 = arith.select %141, %139, %142 : vector<8x32xi1>, vector<8x32xf32>
    %144 = vector.extract_strided_slice %135 {offsets = [1, 0], sizes = [1, 32], strides = [1, 1]} : vector<8x32xf32> to vector<1x32xf32>
    %145 = vector.broadcast %144 : vector<1x32xf32> to vector<8x32xf32>
    %146 = arith.mulf %143, %145 : vector<8x32xf32>
    %147 = arith.addf %138, %146 : vector<8x32xf32>
    %c2_i32_50 = arith.constant 2 : i32
    %148 = tpu.dynamic_rotate %133 by %c2_i32_50 dim 0 : vector<8x32xf32>, i32 -> vector<8x32xf32>
    %c2_i32_51 = arith.constant 2 : i32
    %149 = vector.broadcast %c2_i32_51 : i32 to vector<8x32xi32>
    %150 = arith.cmpi sge, %8, %149 : vector<8x32xi32>
    %cst_52 = arith.constant 0.000000e+00 : f32
    %151 = vector.broadcast %cst_52 : f32 to vector<8x32xf32>
    %152 = arith.select %150, %148, %151 : vector<8x32xi1>, vector<8x32xf32>
    %153 = vector.extract_strided_slice %135 {offsets = [2, 0], sizes = [1, 32], strides = [1, 1]} : vector<8x32xf32> to vector<1x32xf32>
    %154 = vector.broadcast %153 : vector<1x32xf32> to vector<8x32xf32>
    %155 = arith.mulf %152, %154 : vector<8x32xf32>
    %156 = arith.addf %147, %155 : vector<8x32xf32>
    %c3_i32_53 = arith.constant 3 : i32
    %157 = tpu.dynamic_rotate %133 by %c3_i32_53 dim 0 : vector<8x32xf32>, i32 -> vector<8x32xf32>
    %c3_i32_54 = arith.constant 3 : i32
    %158 = vector.broadcast %c3_i32_54 : i32 to vector<8x32xi32>
    %159 = arith.cmpi sge, %8, %158 : vector<8x32xi32>
    %cst_55 = arith.constant 0.000000e+00 : f32
    %160 = vector.broadcast %cst_55 : f32 to vector<8x32xf32>
    %161 = arith.select %159, %157, %160 : vector<8x32xi1>, vector<8x32xf32>
    %162 = vector.extract_strided_slice %135 {offsets = [3, 0], sizes = [1, 32], strides = [1, 1]} : vector<8x32xf32> to vector<1x32xf32>
    %163 = vector.broadcast %162 : vector<1x32xf32> to vector<8x32xf32>
    %164 = arith.mulf %161, %163 : vector<8x32xf32>
    %165 = arith.addf %156, %164 : vector<8x32xf32>
    %c4_i32_56 = arith.constant 4 : i32
    %166 = tpu.dynamic_rotate %133 by %c4_i32_56 dim 0 : vector<8x32xf32>, i32 -> vector<8x32xf32>
    %c4_i32_57 = arith.constant 4 : i32
    %167 = vector.broadcast %c4_i32_57 : i32 to vector<8x32xi32>
    %168 = arith.cmpi sge, %8, %167 : vector<8x32xi32>
    %cst_58 = arith.constant 0.000000e+00 : f32
    %169 = vector.broadcast %cst_58 : f32 to vector<8x32xf32>
    %170 = arith.select %168, %166, %169 : vector<8x32xi1>, vector<8x32xf32>
    %171 = vector.extract_strided_slice %135 {offsets = [4, 0], sizes = [1, 32], strides = [1, 1]} : vector<8x32xf32> to vector<1x32xf32>
    %172 = vector.broadcast %171 : vector<1x32xf32> to vector<8x32xf32>
    %173 = arith.mulf %170, %172 : vector<8x32xf32>
    %174 = arith.addf %165, %173 : vector<8x32xf32>
    %c5_i32_59 = arith.constant 5 : i32
    %175 = tpu.dynamic_rotate %133 by %c5_i32_59 dim 0 : vector<8x32xf32>, i32 -> vector<8x32xf32>
    %c5_i32_60 = arith.constant 5 : i32
    %176 = vector.broadcast %c5_i32_60 : i32 to vector<8x32xi32>
    %177 = arith.cmpi sge, %8, %176 : vector<8x32xi32>
    %cst_61 = arith.constant 0.000000e+00 : f32
    %178 = vector.broadcast %cst_61 : f32 to vector<8x32xf32>
    %179 = arith.select %177, %175, %178 : vector<8x32xi1>, vector<8x32xf32>
    %180 = vector.extract_strided_slice %135 {offsets = [5, 0], sizes = [1, 32], strides = [1, 1]} : vector<8x32xf32> to vector<1x32xf32>
    %181 = vector.broadcast %180 : vector<1x32xf32> to vector<8x32xf32>
    %182 = arith.mulf %179, %181 : vector<8x32xf32>
    %183 = arith.addf %174, %182 : vector<8x32xf32>
    %c6_i32_62 = arith.constant 6 : i32
    %184 = tpu.dynamic_rotate %133 by %c6_i32_62 dim 0 : vector<8x32xf32>, i32 -> vector<8x32xf32>
    %c6_i32_63 = arith.constant 6 : i32
    %185 = vector.broadcast %c6_i32_63 : i32 to vector<8x32xi32>
    %186 = arith.cmpi sge, %8, %185 : vector<8x32xi32>
    %cst_64 = arith.constant 0.000000e+00 : f32
    %187 = vector.broadcast %cst_64 : f32 to vector<8x32xf32>
    %188 = arith.select %186, %184, %187 : vector<8x32xi1>, vector<8x32xf32>
    %189 = vector.extract_strided_slice %135 {offsets = [6, 0], sizes = [1, 32], strides = [1, 1]} : vector<8x32xf32> to vector<1x32xf32>
    %190 = vector.broadcast %189 : vector<1x32xf32> to vector<8x32xf32>
    %191 = arith.mulf %188, %190 : vector<8x32xf32>
    %192 = arith.addf %183, %191 : vector<8x32xf32>
    %c7_i32_65 = arith.constant 7 : i32
    %193 = tpu.dynamic_rotate %133 by %c7_i32_65 dim 0 : vector<8x32xf32>, i32 -> vector<8x32xf32>
    %c7_i32_66 = arith.constant 7 : i32
    %194 = vector.broadcast %c7_i32_66 : i32 to vector<8x32xi32>
    %195 = arith.cmpi sge, %8, %194 : vector<8x32xi32>
    %cst_67 = arith.constant 0.000000e+00 : f32
    %196 = vector.broadcast %cst_67 : f32 to vector<8x32xf32>
    %197 = arith.select %195, %193, %196 : vector<8x32xi1>, vector<8x32xf32>
    %198 = vector.extract_strided_slice %135 {offsets = [7, 0], sizes = [1, 32], strides = [1, 1]} : vector<8x32xf32> to vector<1x32xf32>
    %199 = vector.broadcast %198 : vector<1x32xf32> to vector<8x32xf32>
    %200 = arith.mulf %197, %199 : vector<8x32xf32>
    %201 = arith.addf %192, %200 : vector<8x32xf32>
    %c1_68 = arith.constant 1 : index
    %c0_69 = arith.constant 0 : index
    %202 = vector.load %arg5[%c1_68, %c0_69] : memref<2x32xf32, #tpu.memory_space<vmem>>, vector<1x32xf32>
    %203 = vector.broadcast %202 : vector<1x32xf32> to vector<8x32xf32>
    %204 = arith.mulf %133, %203 : vector<8x32xf32>
    %205 = arith.addf %201, %204 : vector<8x32xf32>
    %cst_70 = arith.constant 5.000000e-01 : f32
    %206 = vector.broadcast %cst_70 : f32 to vector<8x32xf32>
    %207 = arith.mulf %206, %205 : vector<8x32xf32>
    %cst_71 = arith.constant 4.471500e-02 : f32
    %208 = vector.broadcast %cst_71 : f32 to vector<8x32xf32>
    %209 = arith.mulf %208, %205 : vector<8x32xf32>
    %210 = arith.mulf %209, %205 : vector<8x32xf32>
    %211 = arith.mulf %210, %205 : vector<8x32xf32>
    %212 = arith.addf %205, %211 : vector<8x32xf32>
    %cst_72 = arith.constant 0.797884583 : f32
    %213 = vector.broadcast %cst_72 : f32 to vector<8x32xf32>
    %214 = arith.mulf %213, %212 : vector<8x32xf32>
    %215 = math.tanh %214 : vector<8x32xf32>
    %cst_73 = arith.constant 1.000000e+00 : f32
    %216 = vector.broadcast %cst_73 : f32 to vector<8x32xf32>
    %217 = arith.addf %216, %215 : vector<8x32xf32>
    %218 = arith.mulf %207, %217 : vector<8x32xf32>
    %219 = arith.truncf %218 : vector<8x32xf32> to vector<8x32xbf16>
    %c1_74 = arith.constant 1 : index
    %c0_75 = arith.constant 0 : index
    %c0_76 = arith.constant 0 : index
    %220 = vector.load %arg6[%c1_74, %c0_75, %c0_76] : memref<2x32x64xbf16, #tpu.memory_space<vmem>>, vector<1x32x64xbf16>
    %221 = vector.shape_cast %220 : vector<1x32x64xbf16> to vector<32x64xbf16>
    %cst_77 = arith.constant dense<0.000000e+00> : vector<8x64xf32>
    %222 = tpu.matmul %219, %221, %cst_77 {dimension_numbers = #tpu.dot_dimension_numbers<[1], [0], [0], [1], [0, 0, 1, 1], [], []>} : vector<8x32xbf16>, vector<32x64xbf16>, vector<8x64xf32> -> vector<8x64xf32>
    %c1_78 = arith.constant 1 : index
    %c0_79 = arith.constant 0 : index
    %223 = vector.load %arg7[%c1_78, %c0_79] : memref<2x64xf32, #tpu.memory_space<vmem>>, vector<1x64xf32>
    %224 = vector.broadcast %223 : vector<1x64xf32> to vector<8x64xf32>
    %225 = arith.addf %222, %224 : vector<8x64xf32>
    %226 = vector.extract_strided_slice %225 {offsets = [0, 0], sizes = [8, 32], strides = [1, 1]} : vector<8x64xf32> to vector<8x32xf32>
    %227 = vector.extract_strided_slice %225 {offsets = [0, 32], sizes = [8, 32], strides = [1, 1]} : vector<8x64xf32> to vector<8x32xf32>
    %228 = arith.negf %227 : vector<8x32xf32>
    %229 = math.exp %228 : vector<8x32xf32>
    %cst_80 = arith.constant 1.000000e+00 : f32
    %230 = vector.broadcast %cst_80 : f32 to vector<8x32xf32>
    %231 = arith.addf %230, %229 : vector<8x32xf32>
    %232 = arith.divf %230, %231 : vector<8x32xf32>
    %233 = arith.mulf %226, %232 : vector<8x32xf32>
    %234 = arith.addf %233, %133 : vector<8x32xf32>
    %cst_81 = arith.constant dense<0.000000e+00> : vector<8xf32>
    %235 = vector.multi_reduction <add>, %234, %cst_81 [1] : vector<8x32xf32> to vector<8xf32>
    %236 = vector.shape_cast %235 : vector<8xf32> to vector<8x1xf32>
    %cst_82 = arith.constant 3.200000e+01 : f32
    %237 = vector.broadcast %cst_82 : f32 to vector<8x1xf32>
    %238 = arith.divf %236, %237 : vector<8x1xf32>
    %239 = vector.broadcast %238 : vector<8x1xf32> to vector<8x32xf32>
    %240 = arith.subf %234, %239 : vector<8x32xf32>
    %241 = arith.mulf %240, %240 : vector<8x32xf32>
    %cst_83 = arith.constant dense<0.000000e+00> : vector<8xf32>
    %242 = vector.multi_reduction <add>, %241, %cst_83 [1] : vector<8x32xf32> to vector<8xf32>
    %243 = vector.shape_cast %242 : vector<8xf32> to vector<8x1xf32>
    %cst_84 = arith.constant 3.200000e+01 : f32
    %244 = vector.broadcast %cst_84 : f32 to vector<8x1xf32>
    %245 = arith.divf %243, %244 : vector<8x1xf32>
    %246 = vector.broadcast %238 : vector<8x1xf32> to vector<8x32xf32>
    %247 = arith.subf %234, %246 : vector<8x32xf32>
    %cst_85 = arith.constant 9.99999974E-6 : f32
    %248 = vector.broadcast %cst_85 : f32 to vector<8x1xf32>
    %249 = arith.addf %245, %248 : vector<8x1xf32>
    %250 = math.rsqrt %249 : vector<8x1xf32>
    %251 = vector.broadcast %250 : vector<8x1xf32> to vector<8x32xf32>
    %252 = arith.mulf %247, %251 : vector<8x32xf32>
    %c1_86 = arith.constant 1 : index
    %c0_87 = arith.constant 0 : index
    %253 = vector.load %arg8[%c1_86, %c0_87] : memref<2x32xf32, #tpu.memory_space<vmem>>, vector<1x32xf32>
    %254 = vector.broadcast %253 : vector<1x32xf32> to vector<8x32xf32>
    %255 = arith.mulf %252, %254 : vector<8x32xf32>
    %c1_88 = arith.constant 1 : index
    %c0_89 = arith.constant 0 : index
    %256 = vector.load %arg9[%c1_88, %c0_89] : memref<2x32xf32, #tpu.memory_space<vmem>>, vector<1x32xf32>
    %257 = vector.broadcast %256 : vector<1x32xf32> to vector<8x32xf32>
    %258 = arith.addf %255, %257 : vector<8x32xf32>
    %cst_90 = arith.constant dense<0.000000e+00> : vector<32xf32>
    %259 = vector.multi_reduction <add>, %258, %cst_90 [0] : vector<8x32xf32> to vector<32xf32>
    %260 = vector.shape_cast %259 : vector<32xf32> to vector<1x32xf32>
    %cst_91 = arith.constant 8.000000e+00 : f32
    %261 = vector.broadcast %cst_91 : f32 to vector<1x32xf32>
    %262 = arith.divf %260, %261 : vector<1x32xf32>
    %c0_92 = arith.constant 0 : index
    %c0_93 = arith.constant 0 : index
    %c0_94 = arith.constant 0 : index
    %263 = vector.load %arg10[%c0_92, %c0_93, %c0_94] : memref<1x1x32xf32, #tpu.memory_space<vmem>>, vector<1x1x32xf32>
    %264 = vector.shape_cast %263 : vector<1x1x32xf32> to vector<1x32xf32>
    %265 = vector.shape_cast %262 : vector<1x32xf32> to vector<1x1x32xf32>
    tpu.vector_store %arg10[%c0_92, %c0_93, %c0_94], %265 {strides = array<i32>} : memref<1x1x32xf32, #tpu.memory_space<vmem>>, vector<1x1x32xf32>,
    return
  }
  func.func @transform_0(%arg0: i32) -> (i32, i32, i32) {
    %c0_i32 = arith.constant 0 : i32
    %c0_i32_0 = arith.constant 0 : i32
    %c0_i32_1 = arith.constant 0 : i32
    return %arg0, %c0_i32, %c0_i32_0 : i32, i32, i32
  }
  func.func @transform_1(%arg0: i32) -> (i32, i32) {
    %c0_i32 = arith.constant 0 : i32
    %c0_i32_0 = arith.constant 0 : i32
    %c0_i32_1 = arith.constant 0 : i32
    return %c0_i32, %c0_i32_0 : i32, i32
  }
  func.func @transform_2(%arg0: i32) -> (i32, i32) {
    %c0_i32 = arith.constant 0 : i32
    %c0_i32_0 = arith.constant 0 : i32
    %c0_i32_1 = arith.constant 0 : i32
    return %c0_i32, %c0_i32_0 : i32, i32
  }
  func.func @transform_3(%arg0: i32) -> (i32, i32, i32) {
    %c0_i32 = arith.constant 0 : i32
    %c0_i32_0 = arith.constant 0 : i32
    %c0_i32_1 = arith.constant 0 : i32
    %c0_i32_2 = arith.constant 0 : i32
    return %c0_i32, %c0_i32_0, %c0_i32_1 : i32, i32, i32
  }
  func.func @transform_4(%arg0: i32) -> (i32, i32) {
    %c0_i32 = arith.constant 0 : i32
    %c0_i32_0 = arith.constant 0 : i32
    %c0_i32_1 = arith.constant 0 : i32
    return %c0_i32, %c0_i32_0 : i32, i32
  }
  func.func @transform_5(%arg0: i32) -> (i32, i32, i32) {
    %c0_i32 = arith.constant 0 : i32
    %c0_i32_0 = arith.constant 0 : i32
    %c0_i32_1 = arith.constant 0 : i32
    %c0_i32_2 = arith.constant 0 : i32
    return %c0_i32, %c0_i32_0, %c0_i32_1 : i32, i32, i32
  }
  func.func @transform_6(%arg0: i32) -> (i32, i32) {
    %c0_i32 = arith.constant 0 : i32
    %c0_i32_0 = arith.constant 0 : i32
    %c0_i32_1 = arith.constant 0 : i32
    return %c0_i32, %c0_i32_0 : i32, i32
  }
  func.func @transform_7(%arg0: i32) -> (i32, i32) {
    %c0_i32 = arith.constant 0 : i32
    %c0_i32_0 = arith.constant 0 : i32
    %c0_i32_1 = arith.constant 0 : i32
    return %c0_i32, %c0_i32_0 : i32, i32
  }
  func.func @transform_8(%arg0: i32) -> (i32, i32) {
    %c0_i32 = arith.constant 0 : i32
    %c0_i32_0 = arith.constant 0 : i32
    %c0_i32_1 = arith.constant 0 : i32
    return %c0_i32, %c0_i32_0 : i32, i32
  }
  func.func @transform_9(%arg0: i32) -> (i32, i32, i32) {
    %c0_i32 = arith.constant 0 : i32
    %c0_i32_0 = arith.constant 0 : i32
    %c0_i32_1 = arith.constant 0 : i32
    return %arg0, %c0_i32, %c0_i32_0 : i32, i32, i32
  }
}

module attributes {stable_mosaic.version = 11 : i64} {
  func.func @_decoder_kernel(%arg0: memref<2x32xf32, #tpu.memory_space<vmem>>, %arg1: memref<32x80xbf16, #tpu.memory_space<vmem>>, %arg2: memref<20x80xf32, #tpu.memory_space<vmem>>, %arg3: memref<1x80xf32, #tpu.memory_space<vmem>>, %arg4: memref<2x6xf32, #tpu.memory_space<vmem>>) attributes {dimension_semantics = [], scalar_prefetch = 0 : i64, scratch_operands = 0 : i64, tpu.core_type = #tpu.core_type<tc>} {
    %c0 = arith.constant 0 : index
    %c0_0 = arith.constant 0 : index
    %0 = vector.load %arg0[%c0, %c0_0] : memref<2x32xf32, #tpu.memory_space<vmem>>, vector<2x32xf32>
    %1 = arith.truncf %0 : vector<2x32xf32> to vector<2x32xbf16>
    %c0_1 = arith.constant 0 : index
    %c0_2 = arith.constant 0 : index
    %2 = vector.load %arg1[%c0_1, %c0_2] : memref<32x80xbf16, #tpu.memory_space<vmem>>, vector<32x80xbf16>
    %cst = arith.constant dense<0.000000e+00> : vector<2x80xf32>
    %3 = tpu.matmul %1, %2, %cst {dimension_numbers = #tpu.dot_dimension_numbers<[1], [0], [0], [1], [0, 0, 1, 1], [], []>} : vector<2x32xbf16>, vector<32x80xbf16>, vector<2x80xf32> -> vector<2x80xf32>
    %c0_3 = arith.constant 0 : index
    %c0_4 = arith.constant 0 : index
    %4 = vector.load %arg3[%c0_3, %c0_4] : memref<1x80xf32, #tpu.memory_space<vmem>>, vector<1x80xf32>
    %5 = vector.broadcast %4 : vector<1x80xf32> to vector<2x80xf32>
    %6 = arith.addf %3, %5 : vector<2x80xf32>
    %7 = vector.extract_strided_slice %6 {offsets = [0, 0], sizes = [1, 80], strides = [1, 1]} : vector<2x80xf32> to vector<1x80xf32>
    %8 = vector.extract_strided_slice %7 {offsets = [0, 0], sizes = [1, 20], strides = [1, 1]} : vector<1x80xf32> to vector<1x20xf32>
    %9 = math.tanh %8 : vector<1x20xf32>
    %10 = vector.extract_strided_slice %7 {offsets = [0, 20], sizes = [1, 20], strides = [1, 1]} : vector<1x80xf32> to vector<1x20xf32>
    %11 = math.tanh %10 : vector<1x20xf32>
    %12 = vector.extract_strided_slice %7 {offsets = [0, 40], sizes = [1, 20], strides = [1, 1]} : vector<1x80xf32> to vector<1x20xf32>
    %13 = vector.extract_strided_slice %7 {offsets = [0, 60], sizes = [1, 20], strides = [1, 1]} : vector<1x80xf32> to vector<1x20xf32>
    %14 = arith.addf %12, %13 : vector<1x20xf32>
    %15 = arith.negf %14 : vector<1x20xf32>
    %16 = math.exp %15 : vector<1x20xf32>
    %cst_5 = arith.constant 1.000000e+00 : f32
    %17 = vector.broadcast %cst_5 : f32 to vector<1x20xf32>
    %18 = arith.addf %17, %16 : vector<1x20xf32>
    %19 = arith.divf %17, %18 : vector<1x20xf32>
    %cst_6 = arith.constant 1.000000e+00 : f32
    %20 = vector.broadcast %cst_6 : f32 to vector<1x20xf32>
    %21 = arith.subf %20, %19 : vector<1x20xf32>
    %22 = arith.mulf %9, %21 : vector<1x20xf32>
    %23 = arith.mulf %19, %11 : vector<1x20xf32>
    %24 = arith.addf %22, %23 : vector<1x20xf32>
    %25 = vector.extract_strided_slice %24 {offsets = [0, 0], sizes = [1, 6], strides = [1, 1]} : vector<1x20xf32> to vector<1x6xf32>
    %c0_7 = arith.constant 0 : index
    %c0_8 = arith.constant 0 : index
    %26 = vector.load %arg4[%c0_7, %c0_8] : memref<2x6xf32, #tpu.memory_space<vmem>>, vector<1x6xf32>
    tpu.vector_store %arg4[%c0_7, %c0_8], %25 {strides = array<i32>} : memref<2x6xf32, #tpu.memory_space<vmem>>, vector<1x6xf32>,
    %27 = tpu.transpose %24, [1, 0] : vector<1x20xf32> -> vector<20x1xf32>
    %c0_9 = arith.constant 0 : index
    %c0_10 = arith.constant 0 : index
    %28 = vector.load %arg2[%c0_9, %c0_10] : memref<20x80xf32, #tpu.memory_space<vmem>>, vector<20x80xf32>
    %29 = vector.broadcast %27 : vector<20x1xf32> to vector<20x80xf32>
    %30 = arith.mulf %28, %29 : vector<20x80xf32>
    %cst_11 = arith.constant dense<0.000000e+00> : vector<80xf32>
    %31 = vector.multi_reduction <add>, %30, %cst_11 [0] : vector<20x80xf32> to vector<80xf32>
    %32 = vector.shape_cast %31 : vector<80xf32> to vector<1x80xf32>
    %33 = vector.extract_strided_slice %6 {offsets = [1, 0], sizes = [1, 80], strides = [1, 1]} : vector<2x80xf32> to vector<1x80xf32>
    %34 = arith.addf %33, %32 : vector<1x80xf32>
    %35 = vector.extract_strided_slice %34 {offsets = [0, 0], sizes = [1, 20], strides = [1, 1]} : vector<1x80xf32> to vector<1x20xf32>
    %36 = math.tanh %35 : vector<1x20xf32>
    %37 = vector.extract_strided_slice %34 {offsets = [0, 20], sizes = [1, 20], strides = [1, 1]} : vector<1x80xf32> to vector<1x20xf32>
    %38 = math.tanh %37 : vector<1x20xf32>
    %39 = vector.extract_strided_slice %34 {offsets = [0, 40], sizes = [1, 20], strides = [1, 1]} : vector<1x80xf32> to vector<1x20xf32>
    %40 = vector.extract_strided_slice %34 {offsets = [0, 60], sizes = [1, 20], strides = [1, 1]} : vector<1x80xf32> to vector<1x20xf32>
    %41 = arith.addf %39, %40 : vector<1x20xf32>
    %42 = arith.negf %41 : vector<1x20xf32>
    %43 = math.exp %42 : vector<1x20xf32>
    %cst_12 = arith.constant 1.000000e+00 : f32
    %44 = vector.broadcast %cst_12 : f32 to vector<1x20xf32>
    %45 = arith.addf %44, %43 : vector<1x20xf32>
    %46 = arith.divf %44, %45 : vector<1x20xf32>
    %cst_13 = arith.constant 1.000000e+00 : f32
    %47 = vector.broadcast %cst_13 : f32 to vector<1x20xf32>
    %48 = arith.subf %47, %46 : vector<1x20xf32>
    %49 = arith.mulf %36, %48 : vector<1x20xf32>
    %50 = arith.mulf %46, %38 : vector<1x20xf32>
    %51 = arith.addf %49, %50 : vector<1x20xf32>
    %52 = vector.extract_strided_slice %51 {offsets = [0, 0], sizes = [1, 6], strides = [1, 1]} : vector<1x20xf32> to vector<1x6xf32>
    %c1 = arith.constant 1 : index
    %c0_14 = arith.constant 0 : index
    %53 = vector.load %arg4[%c1, %c0_14] : memref<2x6xf32, #tpu.memory_space<vmem>>, vector<1x6xf32>
    tpu.vector_store %arg4[%c1, %c0_14], %52 {strides = array<i32>} : memref<2x6xf32, #tpu.memory_space<vmem>>, vector<1x6xf32>,
    return
  }
}

</mosaic_0001>

<bundles_post_ra>
// kernel: s4_model_forward.3
= control target key start
LH: loop header
LB: loop body
LE: loop exit
PB: predicated region body
PF: predicated region fallthrough
CT: control target
= control target key end

     0   :  { %v293_v1 = vmov 0.0   ;;  %vm294_vm0 = vmmov 0   ;;  %s366_s0 = inlined_call_operand.vmem [shape: f32[2,32], index: 0, kind: input, shape index: {}]   ;;  %s367_s1 = inlined_call_operand.vmem [shape: bf16[32,80], index: 1, kind: input, shape index: {}]   ;;  %s368_s2 = inlined_call_operand.vmem [shape: f32[20,80], index: 2, kind: input, shape index: {}]   ;;  %s369_s3 = inlined_call_operand.vmem [shape: f32[1,80], index: 3, kind: input, shape index: {}]   ;;  %s370_s4 = inlined_call_operand.hbm [shape: f32[2,6], index: 4, kind: output, shape index: {}]  }
   0x1   :  { %v255_v0 = vld [vmem:[%s367_s1] sm:$0xff]   ;;  %238 = vmatprep.subr.bf16.mxu0 %v293_v1  ;;  %v256_v2 = vld [vmem:[%s367_s1 + $0x8] sm:$0xff]   ;;  %242 = vmatprep.mubr.msk.bf16.mxu0 %vm294_vm0, %v293_v1 }
   0x2   :  { %239 = vmatpush3.bf16.msra.mxu0 %v255_v0  ;;  %v19_v3 = vld [vmem:[%s366_s0] sm:$0x3] }
   0x3   :  { %240 = vmatprep.subr.bf16.mxu0 %v293_v1 }
   0x4   :  { %9 = vsyncpa [#allocation3], 0  ;;  %v20_v4 = vpack.c.bf16 %v19_v3, %v19_v3  ;;  %vm44_vm1 = vcmask 261120   ;;  %v229_v5 = vld [vmem:[%s369_s3] ss:$0 sm:$0xff]  ;;  %s295_s1 = smov 108  }
   0x5   :  { %s296_s0 = smov 20   ;;  %v297_v17 = vmov 0   ;;  %s298_s3 = smov 88   ;;  %vm116_vm2 = vcmask 40960   ;;  %v150_v30 = vld [vmem:[%s368_s2] sm:$0xff]  ;;  %v151_v31 = vld [vmem:[%s368_s2 + $0x8] sm:$0xff] }
   0x6   :  { %241 = vmatpush3.bf16.msra.mxu0 %v256_v2  ;;  %253 = vset.pattern.permute.xlu1 %v297_v17  ;;  %vm171_vm3 = vcmask 654336   ;;  %v152_v35 = vld [vmem:[%s368_s2 + $0x10] sm:$0xf]  ;;  %vm175_vm4 = vcmask 650240   ;;  %s299_s2 = smov [#allocation2]   ;;  %vm213_vm5 = vcmask 41985  }
   0x7   :  { %s221_s29 = sshll.u32 %s299_s2, 4  ;;  %s222_s29 = int_to_ptr.vmem [resolvable:$true] %s221_s29 }
   0x8   :  { %s269_s30 = scalar_lea.vmem %s222_s29, 32  ;;  %p274_p1 = scmp.lt.s32.totalorder %s222_s29, %s222_s29 }
   0x9   :  { %243 = vmatmul.mubr.msk.bf16.vlgmr.msra.gmra.mrb[0].mxu0 %vm44_vm1, %v20_v4  ;;  %p270_p0 = scmp.ne.s32.totalorder %s222_s29, %s269_s30  ;;  %p275_p2 = scmp.lt.s32.totalorder %s269_s30, %s269_s30 }
   0xb   :  { %p276_p3 = por %p275_p2, %p274_p1 }
   0xd   :  { %p277_p4 = pnand %p276_p3, %p270_p0 }
  0xdc   :  { %v82_v6 = vpop.f32.mrb[0].mxu0 }
  0xdd   :  { %v83_v7 = vadd.f32 %v229_v5, %v82_v6  ;;  %v244_v8 = vpop.f32.mrb[1].mxu0 }
  0xde   :  { %v85_v9 = vpop.f32.mrb[2].mxu0 }
  0xdf   :  { %257 = vtanh.f32 %v83_v7  ;;  %90 = vrot.lane.b32.xlu0 %v83_v7, %s295_s1  ;;  %v245_v10 = vpop.f32.mrb[3].mxu0 }
  0xe9   :  { %v258_v11 = vpop.eup %257 }
  0xea   :  { %107 = vrot.lane.b32.xlu0 %v258_v11, %s296_s0 }
 0x151   :  { %v91_v12 = vpop.permute.xlu0 %90 }
 0x152   :  { %v93_v13 = vadd.f32 %v91_v12, %v83_v7 }
 0x154   :  { %v233_v14 = vmul.f32 -1.442695, %v93_v13 }
 0x156   :  { %259 = vpow2.f32 %v233_v14 }
 0x15c   :  { %v108_v20 = vpop.permute.xlu0 %107 }
 0x160   :  { %v260_v15 = vpop.eup %259 }
 0x161   :  { %v97_v16 = vadd.f32 1.0, %v260_v15 }
 0x163   :  { %261 = vrcp.f32 %v97_v16 }
 0x16d   :  { %v262_v18 = vpop.eup %261 }
 0x16e   :  { %v100_v19 = vsub.f32 1.0, %v262_v18  ;;  %v110_v21 = vmul.f32 %v262_v18, %v108_v20 }
 0x170   :  { %102 = vrot.lane.b32.xlu1 %v100_v19, %s298_s3 }
 0x174   :  { %112 = vrot.lane.b32.xlu1 %v110_v21, %s298_s3 }
 0x1e2   :  { %v103_v22 = vpop.permute.xlu1 %102 }
 0x1e3   :  { %v105_v23 = vmul.f32 %v258_v11, %v103_v22 }
 0x1e6   :  { %v113_v24 = vpop.permute.xlu1 %112 }
 0x1e7   :  { %v115_v25 = vadd.f32 %v113_v24, %v105_v23 }
 0x1e9   :  { %117 = vst.msk [vmem:[#allocation2] sm:$0x1] %vm116_vm2, %v115_v25  ;;  %118 = vxpose.xlu0.b32.start.end [1/1] (short) (narrow) %v115_v25, 24 }
 0x212   :  { %254 = vset.pattern.permute.xlu0 %v297_v17 }
 0x269   :  { %v134_v26 = vpop.trf.xlu0 }
 0x26a   :  { %155 = vperm.xlu1 %253, %v134_v26  }
 0x26d   :  { %v135_v27 = vpop.trf.xlu0 }
 0x26e   :  { %160 = vperm.xlu1 %253, %v135_v27  }
 0x271   :  { %v136_v28 = vpop.trf.xlu0 }
 0x272   :  { %165 = vperm.xlu1 %253, %v136_v28  }
 0x2e9   :  { %v156_v29 = vpop.permute.xlu1 %155 }
 0x2ea   :  { %v168_v33 = vmul.f32 %v156_v29, %v150_v30 }
 0x2ec   :  { %v172_v38 = vsel %vm171_vm3, %v168_v33, 0.0 }
 0x2ed   :  { %v161_v32 = vpop.permute.xlu1 %160 }
 0x2ee   :  { %v169_v34 = vmul.f32 %v161_v32, %v151_v31 }
 0x2f0   :  { %v173_v36 = vsel %vm171_vm3, %v169_v34, 0.0 }
 0x2f1   :  { %v166_v37 = vpop.permute.xlu1 %165  ;;  %v174_v40 = vadd.f32 %v173_v36, %v172_v38 }
 0x2f2   :  { %v170_v39 = vmul.f32 %v166_v37, %v152_v35 }
 0x2f4   :  { %v176_v41 = vsel %vm175_vm4, %v170_v39, 0.0 }
 0x2f5   :  { %v177_v42 = vadd.f32 %v176_v41, %v174_v40 }
 0x2f7   :  { %v178_v43 = vrot.slane %v177_v42, 4 }
 0x2f9   :  { %v179_v44 = vadd.f32 %v178_v43, %v177_v42 }
 0x2fb   :  { %v180_v45 = vrot.slane %v179_v44, 2 }
 0x2fd   :  { %v181_v46 = vadd.f32 %v180_v45, %v179_v44 }
 0x2ff   :  { %v182_v47 = vrot.slane %v181_v46, 1 }
 0x301   :  { %v183_v48 = vadd.f32 %v182_v47, %v181_v46 }
 0x303   :  { %v184_v49 = vadd.f32 %v183_v48, %v83_v7 }
 0x305   :  { %187 = vrot.lane.b32.xlu1 %v184_v49, %s295_s1  ;;  %263 = vtanh.f32 %v184_v49 }
 0x30f   :  { %v264_v50 = vpop.eup %263 }
 0x310   :  { %204 = vrot.lane.b32.xlu1 %v264_v50, %s296_s0 }
 0x377   :  { %v188_v51 = vpop.permute.xlu1 %187 }
 0x378   :  { %v190_v52 = vadd.f32 %v188_v51, %v184_v49 }
 0x37a   :  { %v234_v53 = vmul.f32 -1.442695, %v190_v52 }
 0x37c   :  { %265 = vpow2.f32 %v234_v53 }
 0x382   :  { %v205_v58 = vpop.permute.xlu1 %204 }
 0x386   :  { %v266_v54 = vpop.eup %265 }
 0x387   :  { %v194_v55 = vadd.f32 1.0, %v266_v54 }
 0x389   :  { %267 = vrcp.f32 %v194_v55 }
 0x393   :  { %v268_v56 = vpop.eup %267 }
 0x394   :  { %v197_v57 = vsub.f32 1.0, %v268_v56  ;;  %v207_v59 = vmul.f32 %v268_v56, %v205_v58 }
 0x396   :  { %199 = vrot.lane.b32.xlu1 %v197_v57, %s298_s3 }
 0x39a   :  { %209 = vrot.lane.b32.xlu1 %v207_v59, %s298_s3 }
 0x408   :  { %v200_v60 = vpop.permute.xlu1 %199 }
 0x409   :  { %v202_v61 = vmul.f32 %v264_v50, %v200_v60 }
 0x40c   :  { %v210_v62 = vpop.permute.xlu1 %209 }
 0x40d   :  { %v212_v63 = vadd.f32 %v210_v62, %v202_v61 }
 0x40f   :  { %214 = vst.msk [vmem:[#allocation2] sm:$0x2] %vm213_vm5, %v212_v63 }
 0x410   :  { %280 = shalt.err (!%p277_p4)
}
 0x411   :  { %s281_s7 = scalar_lea.hbm %s370_s4, 32 }
 0x412   :  { %p282_p5 = scmp.ne.s32.totalorder %s370_s4, %s281_s7  ;;  %p285_p6 = scmp.lt.u32.totalorder %s281_s7, %s370_s4 }
 0x414   :  { %p287_p7 = pnand %p285_p6, %p282_p5 }
 0x416   :  { %290 = shalt.err (!%p287_p7)
}
 0x417   :  { %224 = dma.vmem_to_hbm [thread:$0]  %s222_s29, 32, %s370_s4, [#allocation3]  }
 0x418   :  { %291 = dma.done.wait [#allocation3], 32  }
 0x419   :  { %292 = vsyncadd [#allocation3], 4294967264 }
 0x41a   :  { %228 = vsyncpa [#allocation3], 1 }

// kernel: s4_model_forward.2
= control target key start
LH: loop header
LB: loop body
LE: loop exit
PB: predicated region body
PF: predicated region fallthrough
CT: control target
= control target key end

     0   :  { %s977_s30 = smov 0   ;;  %s1164_s0 = inlined_call_operand.vmem [shape: f32[2,8,12], index: 0, kind: input, shape index: {}]   ;;  %s1165_s1 = inlined_call_operand.vmem [shape: bf16[12,32], index: 1, kind: input, shape index: {}]   ;;  %s1166_s2 = inlined_call_operand.vmem [shape: f32[1,32], index: 2, kind: input, shape index: {}]   ;;  %s1167_s3 = inlined_call_operand.vmem [shape: f32[2,8,32], index: 3, kind: input, shape index: {}]   ;;  %s1168_s4 = inlined_call_operand.vmem [shape: f32[2,32], index: 4, kind: input, shape index: {}]   ;;  %s1169_s5 = inlined_call_operand.vmem [shape: bf16[2,32,64], index: 5, kind: input, shape index: {}]   ;;  %s1170_s6 = inlined_call_operand.vmem [shape: f32[2,64], index: 6, kind: input, shape index: {}]   ;;  %s1171_s7 = inlined_call_operand.vmem [shape: f32[2,32], index: 7, kind: input, shape index: {}]   ;;  %s1172_s8 = inlined_call_operand.vmem [shape: f32[2,32], index: 8, kind: input, shape index: {}]   ;;  %s1173_s9 = inlined_call_operand.vmem [shape: f32[2,1,32], index: 9, kind: output, shape index: {}]  }
   0x1 LB: > { %s822_s10 = sadd.s32 4294967295, %s922_s30   ;;  %p826_p0 = scmp.ge.s32.totalorder %s922_s30, 1  ;;  %s922_s30 = sphi %s977_s30, %s19_s30  }
   0x2   : > { %p286_p1 = scmp.lt.s32.totalorder %s922_s30, 3 }
   0x4   : > { %p287_p2 = pnand %p826_p0, %p286_p1 }
   0x5   : > { %vm347_vm0 = vcmask (!%p287_p2), 1045504   ;;  %v924_v0 = vmov (!%p287_p2), 0.0   ;;  %v895_v1 = vld [vmem:[%s1165_s1] sm:$0x3f] (!%p287_p2)   ;;  %p319_p3 = scmp.lt.s32.totalorder (!%p287_p2), %s822_s10, 1  ;;  %vm925_vm1 = vmmov (!%p287_p2), 0   ;;  %v391_v7 = vlaneseq (!%p287_p2) }
   0x6   : > { %290 = sbr.rel (%p287_p2) target bundleno = 1689 (0x699), region = 56  ;;  %862 = vmatprep.subr.bf16.mxu0 (!%p287_p2), %v924_v0  ;;  %868 = vmatprep.subr.bf16.mxu1 (!%p287_p2), %v924_v0  ;;  %v349_v2 = vsel (!%p287_p2), %vm347_vm0, %v895_v1, 0  ;;  %vm343_vm2 = vcmask (!%p287_p2), 97280   ;;  %v896_v5 = vld [vmem:[%s1169_s5] sm:$0xff] (!%p287_p2)   ;;  %v897_v6 = vld [vmem:[%s1169_s5 + $0x8] sm:$0xff] (!%p287_p2)   ;;  %vm500_vm10 = vcmask (!%p287_p2), 261120  }
   0x7   : > { %864 = vmatprep.mubr.msk.bf16.mxu0 (!%p287_p2), %vm925_vm1, %v924_v0  ;;  %872 = vmatprep.mubr.msk.bf16.mxu1 (!%p287_p2), %vm925_vm1, %v924_v0  ;;  %v1007_v8 = vshrl.u32 (!%p287_p2), %v391_v7, 7  ;;  %v828_v9 = vld [vmem:[%s1166_s2] ss:$0 sm:$0xff] (!%p287_p2)  ;;  %s926_s29 = smov (!%p287_p2), 96   ;;  %vm773_vm11 = vcmask (!%p287_p2), 253952  }
   0x8   : > { %863 = vmatpush3.bf16.msra.mxu0 (!%p287_p2), %v349_v2  ;;  %869 = vmatpush3.bf16.msra.mxu1 (!%p287_p2), %v896_v5  ;;  %v393_v12 = vld [vmem:[%s1167_s3] sm:$0xff] (!%p287_p2) }
   0x9   : > { %876 = vmatprep.subr.bf16.mxu0 (!%p287_p2), %v924_v0  ;;  %870 = vmatprep.subr.bf16.mxu1 (!%p287_p2), %v924_v0  ;;  %v396_v10 = vsub.s32 (!%p287_p2), 0, %v1007_v8  ;;  %v404_v11 = vsub.s32 (!%p287_p2), 1, %v1007_v8  ;;  %v413_v14 = vsub.s32 (!%p287_p2), 2, %v1007_v8  ;;  %v422_v17 = vsub.s32 (!%p287_p2), 3, %v1007_v8  ;;  %v831_v58 = vld [vmem:[%s1168_s4] ss:$0 sm:$0xff] (!%p287_p2) }
   0xa   : > { %vm400_vm3 = vcmp.ge.s32.totalorder (!%p287_p2), %v1007_v8, 1  ;;  %vm409_vm4 = vcmp.ge.s32.totalorder (!%p287_p2), %v1007_v8, 2  ;;  %v431_v25 = vsub.s32 (!%p287_p2), 4, %v1007_v8  ;;  %vm418_vm5 = vcmp.ge.s32.totalorder (!%p287_p2), %v1007_v8, 3 }
   0xb   : > { %v397_v19 = vrot.slane (!%p287_p2), %v393_v12, %v396_v10  ;;  %v405_v20 = vrot.slane (!%p287_p2), %v393_v12, %v404_v11  ;;  %v414_v26 = vrot.slane (!%p287_p2), %v393_v12, %v413_v14  ;;  %v423_v29 = vrot.slane (!%p287_p2), %v393_v12, %v422_v17 }
   0xc   : > { %871 = vmatpush3.bf16.msra.mxu1 (!%p287_p2), %v897_v6  ;;  %vm427_vm6 = vcmp.ge.s32.totalorder (!%p287_p2), %v1007_v8, 4  ;;  %v440_v33 = vsub.s32 (!%p287_p2), 5, %v1007_v8  ;;  %v432_v35 = vrot.slane (!%p287_p2), %v393_v12, %v431_v25  ;;  %vm436_vm7 = vcmp.ge.s32.totalorder (!%p287_p2), %v1007_v8, 5 }
   0xd   : > { %s1175_s10 = smov (!%p319_p3, %s822_s10), 1  ;;  %v449_v39 = vsub.s32 6, %v1007_v8  ;;  %vm445_vm8 = vcmp.ge.s32.totalorder %v1007_v8, 6  ;;  %v458_v45 = vsub.s32 7, %v1007_v8  ;;  %vm454_vm9 = vcmp.ge.s32.totalorder %v1007_v8, 7 }
   0xe   : > { %s827_s13 = sshll.u32 %s1175_s10, 3  ;;  %v441_v44 = vrot.slane %v393_v12, %v440_v33  ;;  %s325_s12 = scalar_lea.vmem %s1173_s9, %s1175_s10 }
   0xf   : > { %s322_s16 = scalar_lea.vmem %s1164_s0, %s827_s13  ;;  %v450_v50 = vrot.slane %v393_v12, %v449_v39  ;;  %v459_v54 = vrot.slane %v393_v12, %v458_v45 }
  0x10   : > { %v327_v3 = vld [vmem:[%s322_s16] sm:$0xff] }
  0x11   : > { %v328_v4 = vpack.c.bf16 %v327_v3, %v327_v3 }
  0x13   : > { %865 = vmatmul.mubr.msk.bf16.vlgmr.msra.gmra.mrb[0].mxu0 %vm343_vm2, %v328_v4 }
  0x14   : > { %880 = vmatprep.mubr.msk.bf16.mxu0 %vm925_vm1, %v924_v0 }
  0xe6   : > { %v385_v13 = vpop.f32.mrb[0].mxu0 }
  0xe7   : > { %v1018_v15 = vadd.f32 %v828_v9, %v385_v13  ;;  %v866_v16 = vpop.f32.mrb[1].mxu0 }
  0xe8   : > { %v388_v18 = vpop.f32.mrb[2].mxu0  ;;  %v832_v16 = vld [vmem:[%s1170_s6] ss:$0 sm:$0xff] }
  0xe9   : > { %v867_v21 = vpop.f32.mrb[3].mxu0  ;;  %v399_v22 = vrot.slane %v1018_v15, 7  ;;  %v408_v23 = vrot.slane %v1018_v15, 6  ;;  %v417_v24 = vrot.slane %v1018_v15, 5  ;;  %v426_v30 = vrot.slane %v1018_v15, 4 }
  0xea   : > { %v398_v31 = vmul.f32 %v397_v19, %v1018_v15  ;;  %v435_v36 = vrot.slane %v1018_v15, 3  ;;  %v444_v41 = vrot.slane %v1018_v15, 2  ;;  %v453_v47 = vrot.slane %v1018_v15, 1 }
  0xeb   : > { %v401_v27 = vsel %vm400_vm3, %v399_v22, 0.0  ;;  %v410_v28 = vsel %vm409_vm4, %v408_v23, 0.0  ;;  %v419_v34 = vsel %vm418_vm5, %v417_v24, 0.0  ;;  %v428_v40 = vsel %vm427_vm6, %v426_v30, 0.0 }
  0xec   : > { %v406_v32 = vmul.f32 %v405_v20, %v401_v27  ;;  %v415_v38 = vmul.f32 %v414_v26, %v410_v28  ;;  %v424_v43 = vmul.f32 %v423_v29, %v419_v34  ;;  %v437_v46 = vsel %vm436_vm7, %v435_v36, 0.0 }
  0xed   : > { %v433_v49 = vmul.f32 %v432_v35, %v428_v40  ;;  %v446_v51 = vsel %vm445_vm8, %v444_v41, 0.0  ;;  %v442_v53 = vmul.f32 %v441_v44, %v437_v46  ;;  %v455_v55 = vsel %vm454_vm9, %v453_v47, 0.0  ;;  %v899_v40 = vld [vmem:[%s1169_s5 + $0x18] sm:$0xff]   ;;  %v837_v44 = vld [vmem:[%s1171_s7] ss:$0 sm:$0xff] }
  0xee   : > { %v407_v37 = vadd.f32 %v406_v32, %v398_v31  ;;  %v451_v57 = vmul.f32 %v450_v50, %v446_v51  ;;  %v460_v60 = vmul.f32 %v459_v54, %v455_v55  ;;  %v467_v62 = vmul.f32 %v831_v58, %v1018_v15  ;;  %v838_v47 = vld [vmem:[%s1172_s8] ss:$0 sm:$0xff] }
  0xf0   : > { %v416_v42 = vadd.f32 %v415_v38, %v407_v37  ;;  %v898_v38 = vld [vmem:[%s1169_s5 + $0x10] sm:$0xff]  }
  0xf1   : > { %877 = vmatpush3.bf16.msra.mxu0 %v898_v38 }
  0xf2   : > { %v425_v48 = vadd.f32 %v424_v43, %v416_v42  ;;  %878 = vmatprep.subr.bf16.mxu0 %v924_v0 }
  0xf4   : > { %v434_v52 = vadd.f32 %v433_v49, %v425_v48  ;;  %v839_v48 = vld [vmem:[%s1167_s3 + $0x8] sm:$0xff] }
  0xf5   : > { %879 = vmatpush3.bf16.msra.mxu0 %v899_v40  ;;  %v587_v50 = vrot.slane %v839_v48, %v396_v10  ;;  %v594_v51 = vrot.slane %v839_v48, %v404_v11  ;;  %v602_v55 = vrot.slane %v839_v48, %v413_v14  ;;  %v610_v11 = vrot.slane %v839_v48, %v422_v17 }
  0xf6   : > { %v443_v56 = vadd.f32 %v442_v53, %v434_v52  ;;  %v618_v14 = vrot.slane %v839_v48, %v431_v25  ;;  %v626_v17 = vrot.slane %v839_v48, %v440_v33  ;;  %v634_v25 = vrot.slane %v839_v48, %v449_v39 }
  0xf8   : > { %v452_v59 = vadd.f32 %v451_v57, %v443_v56 }
  0xfa   : > { %v461_v61 = vadd.f32 %v460_v60, %v452_v59 }
  0xfc   : > { %v468_v63 = vadd.f32 %v467_v62, %v461_v61 }
  0xfe   : > { %v470_v1 = vmul.f32 0.044715, %v468_v63  ;;  %v469_v7 = vmul.f32 0.5, %v468_v63 }
 0x100   : > { %v471_v2 = vmul.f32 %v470_v1, %v468_v63 }
 0x102   : > { %v472_v3 = vmul.f32 %v471_v2, %v468_v63 }
 0x104   : > { %v473_v4 = vadd.f32 %v472_v3, %v468_v63 }
 0x106   : > { %v474_v5 = vmul.f32 0.7978846, %v473_v4 }
 0x108   : > { %900 = vtanh.f32 %v474_v5 }
 0x112   : > { %v901_v6 = vpop.eup %900 }
 0x113   : > { %v476_v9 = vadd.f32 1.0, %v901_v6 }
 0x115   : > { %v477_v12 = vmul.f32 %v476_v9, %v469_v7 }
 0x117   : > { %v478_v13 = vpack.c.bf16 %v477_v12, %v477_v12 }
 0x119   : > { %873 = vmatmul.mubr.msk.bf16.vlgmr.msra.gmra.mrb[0].mxu1 %vm500_vm10, %v478_v13  ;;  %v642_v13 = vrot.slane %v839_v48, %v458_v45 }
 0x1ec   : > { %v538_v18 = vpop.f32.mrb[0].mxu1 }
 0x1ed   : > { %v539_v19 = vadd.f32 %v832_v16, %v538_v18  ;;  %v874_v20 = vpop.f32.mrb[1].mxu1 }
 0x1ee   : > { %v541_v21 = vpop.f32.mrb[2].mxu1 }
 0x1ef   : > { %v836_v22 = vmul.f32 -1.442695, %v539_v19  ;;  %v875_v23 = vpop.f32.mrb[3].mxu1  ;;  %v840_v21 = vld [vmem:[%s1168_s4 + $0x1] ss:$0 sm:$0xff] }
 0x1f1   : > { %902 = vpow2.f32 %v836_v22 }
 0x1fb   : > { %v903_v24 = vpop.eup %902 }
 0x1fc   : > { %v547_v26 = vadd.f32 1.0, %v903_v24 }
 0x1fe   : > { %904 = vrcp.f32 %v547_v26 }
 0x208   : > { %v905_v27 = vpop.eup %904 }
 0x209   : > { %551 = vrot.lane.b32.xlu0 %v905_v27, %s926_s29 }
 0x27b   : > { %v552_v28 = vpop.permute.xlu0 %551 }
 0x27c   : > { %v554_v29 = vmul.f32 %v552_v28, %v539_v19 }
 0x27e   : > { %v555_v30 = vadd.f32 %v554_v29, %v1018_v15 }
 0x280   : > { %v556_v31 = vsel %vm500_vm10, %v555_v30, 0.0 }
 0x281   : > { %557 = vadd.xlane.f32.xlu0 %v556_v31 }
 0x30e   : > { %v558_v32 = vpop.xlane.xlu0 %557 }
 0x30f   : > { %v560_v34 = vmul.f32 0.03125, %v558_v32 }
 0x311   : > { %v561_v35 = vsub.f32 %v555_v30, %v560_v34 }
 0x313   : > { %v562_v36 = vmul.f32 %v561_v35, %v561_v35 }
 0x315   : > { %v563_v37 = vsel %vm500_vm10, %v562_v36, 0.0  ;;  %v845_v36 = vld [vmem:[%s1170_s6 + $0x1] ss:$0 sm:$0xff] }
 0x316   : > { %564 = vadd.xlane.f32.xlu1 %v563_v37 }
 0x3a3   : > { %v565_v15 = vpop.xlane.xlu1 %564 }
 0x3a4   : > { %v566_v41 = vmul.f32 0.03125, %v565_v15 }
 0x3a6   : > { %v567_v42 = vadd.f32 1e-05, %v566_v41 }
 0x3a8   : > { %906 = vrsqrt.f32 %v567_v42 }
 0x3b2   : > { %v907_v43 = vpop.eup %906 }
 0x3b3   : > { %v569_v46 = vmul.f32 %v907_v43, %v561_v35 }
 0x3b5   : > { %v575_v0 = vmul.f32 %v837_v44, %v569_v46 }
 0x3b7   : > { %v1098_v49 = vadd.f32 %v838_v47, %v575_v0 }
 0x3b9   : > { %v589_v52 = vrot.slane %v1098_v49, 7  ;;  %v597_v53 = vrot.slane %v1098_v49, 6  ;;  %v605_v54 = vrot.slane %v1098_v49, 5  ;;  %v613_v10 = vrot.slane %v1098_v49, 4 }
 0x3ba   : > { %v588_v58 = vmul.f32 %v587_v50, %v1098_v49  ;;  %v621_v61 = vrot.slane %v1098_v49, 3  ;;  %v629_v2 = vrot.slane %v1098_v49, 2  ;;  %v637_v6 = vrot.slane %v1098_v49, 1 }
 0x3bb   : > { %v590_v56 = vsel %vm400_vm3, %v589_v52, 0.0  ;;  %v598_v57 = vsel %vm409_vm4, %v597_v53, 0.0  ;;  %v606_v60 = vsel %vm418_vm5, %v605_v54, 0.0  ;;  %v614_v1 = vsel %vm427_vm6, %v613_v10, 0.0 }
 0x3bc   : > { %v595_v59 = vmul.f32 %v594_v51, %v590_v56  ;;  %v603_v63 = vmul.f32 %v602_v55, %v598_v57  ;;  %v611_v4 = vmul.f32 %v610_v11, %v606_v60  ;;  %v622_v5 = vsel %vm436_vm7, %v621_v61, 0.0 }
 0x3bd   : > { %v619_v9 = vmul.f32 %v618_v14, %v614_v1  ;;  %v630_v12 = vsel %vm445_vm8, %v629_v2, 0.0  ;;  %v627_v33 = vmul.f32 %v626_v17, %v622_v5  ;;  %v638_v18 = vsel %vm454_vm9, %v637_v6, 0.0 }
 0x3be   : > { %v596_v62 = vadd.f32 %v595_v59, %v588_v58  ;;  %v635_v20 = vmul.f32 %v634_v25, %v630_v12  ;;  %v643_v22 = vmul.f32 %v642_v13, %v638_v18  ;;  %v650_v24 = vmul.f32 %v840_v21, %v1098_v49  ;;  %v851_v59 = vld [vmem:[%s1172_s8 + $0x1] ss:$0 sm:$0xff] }
 0x3c0   : > { %v604_v3 = vadd.f32 %v603_v63, %v596_v62 }
 0x3c2   : > { %v612_v7 = vadd.f32 %v611_v4, %v604_v3 }
 0x3c4   : > { %v620_v16 = vadd.f32 %v619_v9, %v612_v7 }
 0x3c6   : > { %v628_v19 = vadd.f32 %v627_v33, %v620_v16 }
 0x3c8   : > { %v636_v39 = vadd.f32 %v635_v20, %v628_v19 }
 0x3ca   : > { %v644_v23 = vadd.f32 %v643_v22, %v636_v39 }
 0x3cc   : > { %v651_v26 = vadd.f32 %v650_v24, %v644_v23 }
 0x3ce   : > { %v653_v27 = vmul.f32 0.044715, %v651_v26  ;;  %v652_v31 = vmul.f32 0.5, %v651_v26 }
 0x3d0   : > { %v654_v28 = vmul.f32 %v653_v27, %v651_v26 }
 0x3d2   : > { %v655_v45 = vmul.f32 %v654_v28, %v651_v26 }
 0x3d4   : > { %v656_v29 = vadd.f32 %v655_v45, %v651_v26 }
 0x3d6   : > { %v657_v30 = vmul.f32 0.7978846, %v656_v29 }
 0x3d8   : > { %908 = vtanh.f32 %v657_v30 }
 0x3e2   : > { %v909_v8 = vpop.eup %908 }
 0x3e3   : > { %v659_v32 = vadd.f32 1.0, %v909_v8 }
 0x3e5   : > { %v660_v34 = vmul.f32 %v659_v32, %v652_v31 }
 0x3e7   : > { %v661_v35 = vpack.c.bf16 %v660_v34, %v660_v34 }
 0x3e9   : > { %881 = vmatmul.mubr.msk.bf16.vlgmr.msra.gmra.mrb[4].mxu0 %vm500_vm10, %v661_v35 }
 0x4bc   : > { %v721_v37 = vpop.f32.mrb[4].mxu0 }
 0x4bd   : > { %v722_v38 = vadd.f32 %v845_v36, %v721_v37  ;;  %v882_v40 = vpop.f32.mrb[5].mxu0 }
 0x4be   : > { %v724_v15 = vpop.f32.mrb[6].mxu0 }
 0x4bf   : > { %v849_v41 = vmul.f32 -1.442695, %v722_v38  ;;  %v883_v42 = vpop.f32.mrb[7].mxu0 }
 0x4c1   : > { %910 = vpow2.f32 %v849_v41 }
 0x4cb   : > { %v911_v43 = vpop.eup %910 }
 0x4cc   : > { %v730_v44 = vadd.f32 1.0, %v911_v43 }
 0x4ce   : > { %912 = vrcp.f32 %v730_v44 }
 0x4d8   : > { %v913_v46 = vpop.eup %912 }
 0x4d9   : > { %734 = vrot.lane.b32.xlu1 %v913_v46, %s926_s29 }
 0x54b   : > { %v735_v47 = vpop.permute.xlu1 %734 }
 0x54c   : > { %v737_v48 = vmul.f32 %v735_v47, %v722_v38 }
 0x54e   : > { %v738_v0 = vadd.f32 %v737_v48, %v1098_v49  ;;  %v850_v49 = vld [vmem:[%s1171_s7 + $0x1] ss:$0 sm:$0xff] }
 0x550   : > { %v739_v50 = vsel %vm500_vm10, %v738_v0, 0.0 }
 0x551   : > { %740 = vadd.xlane.f32.xlu1 %v739_v50 }
 0x5de   : > { %v741_v51 = vpop.xlane.xlu1 %740 }
 0x5df   : > { %v742_v52 = vmul.f32 0.03125, %v741_v51 }
 0x5e1   : > { %v743_v53 = vsub.f32 %v738_v0, %v742_v52 }
 0x5e3   : > { %v744_v54 = vmul.f32 %v743_v53, %v743_v53 }
 0x5e5   : > { %v745_v55 = vsel %vm500_vm10, %v744_v54, 0.0 }
 0x5e6   : > { %746 = vadd.xlane.f32.xlu0 %v745_v55 }
 0x673   : > { %v747_v56 = vpop.xlane.xlu0 %746 }
 0x674   : > { %v748_v57 = vmul.f32 0.03125, %v747_v56 }
 0x676   : > { %v749_v10 = vadd.f32 1e-05, %v748_v57 }
 0x678   : > { %914 = vrsqrt.f32 %v749_v10 }
 0x682   : > { %v915_v11 = vpop.eup %914 }
 0x683   : > { %v751_v58 = vmul.f32 %v915_v11, %v743_v53 }
 0x685   : > { %v757_v60 = vmul.f32 %v850_v49, %v751_v58 }
 0x687   : > { %v763_v61 = vadd.f32 %v851_v59, %v757_v60 }
 0x689   : > { %v764_v14 = vsel %vm500_vm10, %v763_v61, 0.0 }
 0x68a   : > { %v765_v62 = vrot.slane %v764_v14, 4 }
 0x68c   : > { %v766_v63 = vadd.f32 %v765_v62, %v764_v14 }
 0x68e   : > { %v767_v1 = vrot.slane %v766_v63, 2 }
 0x690   : > { %v768_v2 = vadd.f32 %v767_v1, %v766_v63 }
 0x692   : > { %v769_v17 = vrot.slane %v768_v2, 1 }
 0x694   : > { %v770_v3 = vadd.f32 %v769_v17, %v768_v2 }
 0x696   : > { %v772_v4 = vmul.f32 0.125, %v770_v3 }
 0x698   : > { %774 = vst.msk [vmem:[%s325_s12] sm:$0x1] %vm773_vm11, %v772_v4 }
 0x699 PF: > { %s19_s30 = sadd.s32 1, %s922_s30  }
 0x69a   : > { %p16_p4 = scmp.ge.s32.totalorder %s19_s30, 4  }
 0x69c   :  { %18 = sbr.rel (!%p16_p4) target bundleno = 1 (0x1), region = 88 }

</bundles_post_ra>
